<compile_context>
chip_gen: v7x
topology: tpu7x:2x2x1
jax: 0.10.0
libtpu: 0.0.40
codegen_flags: <defaults>
</compile_context>

<pallas_src>
import functools

import jax
import jax.numpy as jnp
from jax.experimental import pallas as pl
from jax.experimental.pallas import tpu as pltpu

_LN_EPS = 1e-5


def _round_up(x, m):
    return (x + m - 1) // m * m


def _pad_rows(a, rows):
    a = jnp.asarray(a, jnp.float32)
    return jnp.pad(a, ((0, rows - a.shape[0]), (0, 0)))


def _layernorm(x, g, b):
    # Two-pass LayerNorm in f32 (mean, then centered variance).
    mu = jnp.mean(x, axis=-1, keepdims=True)
    xc = x - mu
    var = jnp.mean(xc * xc, axis=-1, keepdims=True)
    return xc * jax.lax.rsqrt(var + _LN_EPS) * g + b


def _r_critic_kernel(H,
                     obs_ref, h_ref, m_ref,
                     ln0g_ref, ln0b_ref,
                     w1_ref, b1_ref, ln1g_ref, ln1b_ref,
                     w2_ref, b2_ref, ln2g_ref, ln2b_ref,
                     wg_ref, bg_ref,
                     ln3g_ref, ln3b_ref,
                     wv_ref, bv_ref,
                     val_ref, hout_ref):
    f32 = jnp.float32
    bf16 = jnp.bfloat16

    # ---- MLPBase: feature LayerNorm, then 2x (Linear -> ReLU -> LayerNorm) ----
    x = _layernorm(obs_ref[...], ln0g_ref[...], ln0b_ref[...])

    x = jnp.dot(x.astype(bf16), w1_ref[...], preferred_element_type=f32) + b1_ref[...]
    x = jnp.maximum(x, 0.0)                      # ReLU (use_ReLU=True)
    x = _layernorm(x, ln1g_ref[...], ln1b_ref[...])

    x = jnp.dot(x.astype(bf16), w2_ref[...], preferred_element_type=f32) + b2_ref[...]
    x = jnp.maximum(x, 0.0)
    x = _layernorm(x, ln2g_ref[...], ln2b_ref[...])

    # ---- RNNLayer: single-step GRU (recurrent_N = 1), masked hidden state ----
    h = h_ref[...] * m_ref[...]                  # (tb, H) * (tb, 1)

    # One fused MXU pass (K = 2H): [x, h] @ W_fused
    #   columns: [ (gi+gh)_r | (gi+gh)_z | gi_n | gh_n ]   (biases folded into bg)
    xh = jnp.concatenate([x, h], axis=-1).astype(bf16)                         # (tb, 2H)
    gates = jnp.dot(xh, wg_ref[...], preferred_element_type=f32) + bg_ref[...]  # (tb, 4H)

    r = jax.nn.sigmoid(gates[:, 0 * H:1 * H])
    z = jax.nn.sigmoid(gates[:, 1 * H:2 * H])
    n = jnp.tanh(gates[:, 2 * H:3 * H] + r * gates[:, 3 * H:4 * H])
    h_new = (1.0 - z) * n + z * h
    hout_ref[...] = h_new

    # post-GRU LayerNorm (RNNLayer.norm)
    feat = _layernorm(h_new, ln3g_ref[...], ln3b_ref[...])

    # ---- v_out: Linear(hidden, 1) as VPU multiply + lane reduction (narrow output) ----
    val_ref[...] = jnp.sum(feat * wv_ref[...], axis=-1, keepdims=True) + bv_ref[...]


def _prep_params(params, D, H):
    """bf16 matmul weights, fused GRU weight (2H, 4H), transposed value-head row."""
    f32, bf16 = jnp.float32, jnp.bfloat16

    w_ih = jnp.asarray(params["w_ih"], f32)                     # (H, 3H), gate order r,z,n
    w_hh = jnp.asarray(params["w_hh"], f32)                     # (H, 3H)
    b_ih = jnp.asarray(params["b_ih"], f32).reshape(1, 3 * H)
    b_hh = jnp.asarray(params["b_hh"], f32).reshape(1, 3 * H)
    zeros = jnp.zeros((H, H), f32)
    # fused columns: [ r | z | n_input | n_hidden ]
    w_top = jnp.concatenate([w_ih[:, :2 * H], w_ih[:, 2 * H:], zeros], axis=1)   # (H, 4H)
    w_bot = jnp.concatenate([w_hh[:, :2 * H], zeros, w_hh[:, 2 * H:]], axis=1)   # (H, 4H)
    w_gru = jnp.concatenate([w_top, w_bot], axis=0).astype(bf16)                  # (2H, 4H)
    b_gru = jnp.concatenate([b_ih[:, :2 * H] + b_hh[:, :2 * H],
                             b_ih[:, 2 * H:], b_hh[:, 2 * H:]], axis=1)           # (1, 4H)

    def row(a):
        return jnp.asarray(a, f32).reshape(1, -1)

    return dict(
        ln0_g=row(params["ln0_g"]), ln0_b=row(params["ln0_b"]),
        w1=jnp.asarray(params["w1"], bf16), b1=row(params["b1"]),
        ln1_g=row(params["ln1_g"]), ln1_b=row(params["ln1_b"]),
        w2=jnp.asarray(params["w2"], bf16), b2=row(params["b2"]),
        ln2_g=row(params["ln2_g"]), ln2_b=row(params["ln2_b"]),
        w_gru=w_gru, b_gru=b_gru,
        ln3_g=row(params["ln3_g"]), ln3_b=row(params["ln3_b"]),
        # value head stays f32: it runs on the VPU (lane reduce), not the MXU.
        w_v=jnp.asarray(params["w_v"], f32).reshape(H, 1).T,    # (1, H)
        b_v=jnp.asarray(params["b_v"], f32).reshape(1, 1),
    )


def r_critic_forward(cent_obs, rnn_states, masks, params, *, batch_tile=1024):
    """cent_obs: (B, D); rnn_states: (B, 1, H); masks: (B, 1).
    Returns (values (B, 1), rnn_states (B, 1, H))."""
    B, D = cent_obs.shape
    H = rnn_states.shape[-1]

    # Large batch tiles amortize the ~0.35 us/grid-step overhead; multiple of 128 once B
    # is large (full MXU M / sublane-friendly), multiple of 8 for tiny batches.
    if B >= 128:
        tb = min(_round_up(batch_tile, 128), _round_up(B, 128))
    else:
        tb = _round_up(min(batch_tile, B), 8)
    B_pad = _round_up(B, tb)
    grid = (B_pad // tb,)

    # Row-pad activations only (no lane padding -> true-width HBM traffic).
    obs_p = _pad_rows(cent_obs, B_pad)
    h_p = _pad_rows(jnp.reshape(rnn_states, (B, H)), B_pad)
    m_p = _pad_rows(masks, B_pad)

    pp = _prep_params(params, D, H)

    def row_spec(width):
        return pl.BlockSpec((tb, width), lambda i: (i, 0))

    def const_spec(arr):
        # Constant block index across the batch grid -> DMAed once, VMEM-resident.
        return pl.BlockSpec(arr.shape, lambda i: (0, 0))

    const_order = ["ln0_g", "ln0_b", "w1", "b1", "ln1_g", "ln1_b",
                   "w2", "b2", "ln2_g", "ln2_b", "w_gru", "b_gru",
                   "ln3_g", "ln3_b", "w_v", "b_v"]

    in_specs = ([row_spec(D), row_spec(H), row_spec(1)]
                + [const_spec(pp[k]) for k in const_order])
    out_specs = (row_spec(1), row_spec(H))

    matmul_flops = 2 * B_pad * (D * H + H * H + (2 * H) * (4 * H) + H)
    weight_bytes = (2 * (D * H + H * H + 2 * H * 4 * H)           # bf16 matmul weights
                    + 4 * (2 * D + 8 * H + 4 * H + H + 1))        # f32 LN params / biases
    bytes_accessed = 4 * B_pad * (D + 2 * H + 2) + weight_bytes
    cost = pl.CostEstimate(flops=matmul_flops,
                           transcendentals=3 * B_pad * H,
                           bytes_accessed=bytes_accessed)

    kernel = functools.partial(_r_critic_kernel, H)

    values_p, h_out_p = pl.pallas_call(
        kernel,
        out_shape=(
            jax.ShapeDtypeStruct((B_pad, 1), jnp.float32),
            jax.ShapeDtypeStruct((B_pad, H), jnp.float32),
        ),
        grid_spec=pltpu.PrefetchScalarGridSpec(
            num_scalar_prefetch=0,
            grid=grid,
            in_specs=in_specs,
            out_specs=out_specs,
        ),
        compiler_params=pltpu.CompilerParams(
            dimension_semantics=("parallel",),
        ),
        cost_estimate=cost,
    )(obs_p, h_p, m_p, *[pp[k] for k in const_order])

    values = values_p[:B]
    rnn_states_out = h_out_p[:B].reshape(B, 1, H)
    return values, rnn_states_out


def r_critic_reference(cent_obs, rnn_states, masks, p):
    """Pure-JAX f32 reference with the exact torch semantics."""
    def ln(x, g, b):
        mu = x.mean(-1, keepdims=True)
        var = ((x - mu) ** 2).mean(-1, keepdims=True)
        return (x - mu) / jnp.sqrt(var + _LN_EPS) * g + b

    x = ln(cent_obs, p["ln0_g"], p["ln0_b"])
    x = jnp.maximum(x @ p["w1"] + p["b1"], 0.0)
    x = ln(x, p["ln1_g"], p["ln1_b"])
    x = jnp.maximum(x @ p["w2"] + p["b2"], 0.0)
    x = ln(x, p["ln2_g"], p["ln2_b"])

    H = rnn_states.shape[-1]
    h = rnn_states[:, 0, :] * masks
    gi = x @ p["w_ih"] + p["b_ih"]
    gh = h @ p["w_hh"] + p["b_hh"]
    r = jax.nn.sigmoid(gi[:, :H] + gh[:, :H])
    z = jax.nn.sigmoid(gi[:, H:2 * H] + gh[:, H:2 * H])
    n = jnp.tanh(gi[:, 2 * H:] + r * gh[:, 2 * H:])
    h_new = (1.0 - z) * n + z * h

    feat = ln(h_new, p["ln3_g"], p["ln3_b"])
    values = feat @ p["w_v"] + p["b_v"]
    return values, h_new[:, None, :]


def make_params(key, obs_dim, hidden):
    """Deterministic synthetic parameter init (stands in for orthogonal/xavier init)."""
    ks = jax.random.split(key, 8)

    def dense(k, din, dout):
        return (1.0 / jnp.sqrt(din)) * jax.random.normal(k, (din, dout), jnp.float32)

    return {
        # MLPBase
        "ln0_g": jnp.ones((1, obs_dim), jnp.float32),
        "ln0_b": jnp.zeros((1, obs_dim), jnp.float32),
        "w1": dense(ks[0], obs_dim, hidden),
        "b1": jnp.zeros((1, hidden), jnp.float32),
        "ln1_g": jnp.ones((1, hidden), jnp.float32),
        "ln1_b": jnp.zeros((1, hidden), jnp.float32),
        "w2": dense(ks[1], hidden, hidden),
        "b2": jnp.zeros((1, hidden), jnp.float32),
        "ln2_g": jnp.ones((1, hidden), jnp.float32),
        "ln2_b": jnp.zeros((1, hidden), jnp.float32),
        # GRU (gate order r, z, n — matches torch.nn.GRU); stored (in, 3*hidden)
        "w_ih": dense(ks[2], hidden, 3 * hidden),
        "b_ih": jnp.zeros((1, 3 * hidden), jnp.float32),
        "w_hh": dense(ks[3], hidden, 3 * hidden),
        "b_hh": jnp.zeros((1, 3 * hidden), jnp.float32),
        "ln3_g": jnp.ones((1, hidden), jnp.float32),
        "ln3_b": jnp.zeros((1, hidden), jnp.float32),
        # value head
        "w_v": dense(ks[4], hidden, 1),
        "b_v": jnp.zeros((1, 1), jnp.float32),
    }


if __name__ == "__main__":
    key = jax.random.PRNGKey(0)
    B, OBS_DIM, HIDDEN, RECURRENT_N = 96, 24, 32, 1

    k_obs, k_h, k_m, k_p = jax.random.split(key, 4)
    cent_obs = jax.random.normal(k_obs, (B, OBS_DIM), jnp.float32)
    rnn_states = jax.random.normal(k_h, (B, RECURRENT_N, HIDDEN), jnp.float32)
    masks = (jax.random.uniform(k_m, (B, 1)) > 0.2).astype(jnp.float32)

    params = make_params(k_p, OBS_DIM, HIDDEN)

    # batch_tile=32 -> grid=(3,) at this small demo size (exercises the pipelined batch grid).
    values, new_rnn_states = r_critic_forward(
        cent_obs, rnn_states, masks, params, batch_tile=32)
    jax.block_until_ready((values, new_rnn_states))

    assert values.shape == (B, 1)
    assert new_rnn_states.shape == (B, RECURRENT_N, HIDDEN)

    # numerical check against the pure-JAX f32 reference (tolerance relaxed for bf16 dots)
    ref_vals, ref_h = r_critic_reference(cent_obs, rnn_states, masks, params)
    assert jnp.allclose(values, ref_vals, atol=3e-2, rtol=3e-2), \
        float(jnp.max(jnp.abs(values - ref_vals)))
    assert jnp.allclose(new_rnn_states, ref_h, atol=3e-2, rtol=3e-2), \
        float(jnp.max(jnp.abs(new_rnn_states - ref_h)))

    print("KERNEL_OK")
</pallas_src>

<mosaic_0001>
module attributes {stable_mosaic.version = 11 : i64} {
  func.func @_r_critic_kernel(%arg0: i32, %arg1: memref<32x24xf32, #tpu.memory_space<vmem>>, %arg2: memref<32x32xf32, #tpu.memory_space<vmem>>, %arg3: memref<32x1xf32, #tpu.memory_space<vmem>>, %arg4: memref<1x24xf32, #tpu.memory_space<vmem>>, %arg5: memref<1x24xf32, #tpu.memory_space<vmem>>, %arg6: memref<24x32xbf16, #tpu.memory_space<vmem>>, %arg7: memref<1x32xf32, #tpu.memory_space<vmem>>, %arg8: memref<1x32xf32, #tpu.memory_space<vmem>>, %arg9: memref<1x32xf32, #tpu.memory_space<vmem>>, %arg10: memref<32x32xbf16, #tpu.memory_space<vmem>>, %arg11: memref<1x32xf32, #tpu.memory_space<vmem>>, %arg12: memref<1x32xf32, #tpu.memory_space<vmem>>, %arg13: memref<1x32xf32, #tpu.memory_space<vmem>>, %arg14: memref<64x128xbf16, #tpu.memory_space<vmem>>, %arg15: memref<1x128xf32, #tpu.memory_space<vmem>>, %arg16: memref<1x32xf32, #tpu.memory_space<vmem>>, %arg17: memref<1x32xf32, #tpu.memory_space<vmem>>, %arg18: memref<1x32xf32, #tpu.memory_space<vmem>>, %arg19: memref<1x1xf32, #tpu.memory_space<vmem>>, %arg20: memref<32x1xf32, #tpu.memory_space<vmem>>, %arg21: memref<32x32xf32, #tpu.memory_space<vmem>>) attributes {dimension_semantics = [#tpu.dimension_semantics<parallel>], iteration_bounds = array<i64: 3>, scalar_prefetch = 0 : i64, scratch_operands = 0 : i64, tpu.core_type = #tpu.core_type<tc>, window_params = [{transform_indices = @transform_0, window_bounds = array<i64: 32, 24>}, {transform_indices = @transform_1, window_bounds = array<i64: 32, 32>}, {transform_indices = @transform_2, window_bounds = array<i64: 32, 1>}, {pipeline_mode = #tpu.pipeline_mode<synchronous>, transform_indices = @transform_3, window_bounds = array<i64: 1, 24>}, {pipeline_mode = #tpu.pipeline_mode<synchronous>, transform_indices = @transform_4, window_bounds = array<i64: 1, 24>}, {pipeline_mode = #tpu.pipeline_mode<synchronous>, transform_indices = @transform_5, window_bounds = array<i64: 24, 32>}, {pipeline_mode = #tpu.pipeline_mode<synchronous>, transform_indices = @transform_6, window_bounds = array<i64: 1, 32>}, {pipeline_mode = #tpu.pipeline_mode<synchronous>, transform_indices = @transform_7, window_bounds = array<i64: 1, 32>}, {pipeline_mode = #tpu.pipeline_mode<synchronous>, transform_indices = @transform_8, window_bounds = array<i64: 1, 32>}, {pipeline_mode = #tpu.pipeline_mode<synchronous>, transform_indices = @transform_9, window_bounds = array<i64: 32, 32>}, {pipeline_mode = #tpu.pipeline_mode<synchronous>, transform_indices = @transform_10, window_bounds = array<i64: 1, 32>}, {pipeline_mode = #tpu.pipeline_mode<synchronous>, transform_indices = @transform_11, window_bounds = array<i64: 1, 32>}, {pipeline_mode = #tpu.pipeline_mode<synchronous>, transform_indices = @transform_12, window_bounds = array<i64: 1, 32>}, {pipeline_mode = #tpu.pipeline_mode<synchronous>, transform_indices = @transform_13, window_bounds = array<i64: 64, 128>}, {pipeline_mode = #tpu.pipeline_mode<synchronous>, transform_indices = @transform_14, window_bounds = array<i64: 1, 128>}, {pipeline_mode = #tpu.pipeline_mode<synchronous>, transform_indices = @transform_15, window_bounds = array<i64: 1, 32>}, {pipeline_mode = #tpu.pipeline_mode<synchronous>, transform_indices = @transform_16, window_bounds = array<i64: 1, 32>}, {pipeline_mode = #tpu.pipeline_mode<synchronous>, transform_indices = @transform_17, window_bounds = array<i64: 1, 32>}, {pipeline_mode = #tpu.pipeline_mode<synchronous>, transform_indices = @transform_18, window_bounds = array<i64: 1, 1>}, {transform_indices = @transform_19, window_bounds = array<i64: 32, 1>}, {transform_indices = @transform_20, window_bounds = array<i64: 32, 32>}]} {
    %c0 = arith.constant 0 : index
    %c0_0 = arith.constant 0 : index
    %0 = vector.load %arg1[%c0, %c0_0] : memref<32x24xf32, #tpu.memory_space<vmem>>, vector<32x24xf32>
    %c0_1 = arith.constant 0 : index
    %c0_2 = arith.constant 0 : index
    %1 = vector.load %arg4[%c0_1, %c0_2] : memref<1x24xf32, #tpu.memory_space<vmem>>, vector<1x24xf32>
    %c0_3 = arith.constant 0 : index
    %c0_4 = arith.constant 0 : index
    %2 = vector.load %arg5[%c0_3, %c0_4] : memref<1x24xf32, #tpu.memory_space<vmem>>, vector<1x24xf32>
    %cst = arith.constant dense<0.000000e+00> : vector<32xf32>
    %3 = vector.multi_reduction <add>, %0, %cst [1] : vector<32x24xf32> to vector<32xf32>
    %4 = vector.shape_cast %3 : vector<32xf32> to vector<32x1xf32>
    %cst_5 = arith.constant 2.400000e+01 : f32
    %5 = vector.broadcast %cst_5 : f32 to vector<32x1xf32>
    %6 = arith.divf %4, %5 : vector<32x1xf32>
    %7 = vector.broadcast %6 : vector<32x1xf32> to vector<32x24xf32>
    %8 = arith.subf %0, %7 : vector<32x24xf32>
    %9 = arith.mulf %8, %8 : vector<32x24xf32>
    %cst_6 = arith.constant dense<0.000000e+00> : vector<32xf32>
    %10 = vector.multi_reduction <add>, %9, %cst_6 [1] : vector<32x24xf32> to vector<32xf32>
    %11 = vector.shape_cast %10 : vector<32xf32> to vector<32x1xf32>
    %cst_7 = arith.constant 2.400000e+01 : f32
    %12 = vector.broadcast %cst_7 : f32 to vector<32x1xf32>
    %13 = arith.divf %11, %12 : vector<32x1xf32>
    %cst_8 = arith.constant 9.99999974E-6 : f32
    %14 = vector.broadcast %cst_8 : f32 to vector<32x1xf32>
    %15 = arith.addf %13, %14 : vector<32x1xf32>
    %16 = math.rsqrt %15 : vector<32x1xf32>
    %17 = vector.broadcast %16 : vector<32x1xf32> to vector<32x24xf32>
    %18 = arith.mulf %8, %17 : vector<32x24xf32>
    %19 = vector.broadcast %1 : vector<1x24xf32> to vector<32x24xf32>
    %20 = arith.mulf %18, %19 : vector<32x24xf32>
    %21 = vector.broadcast %2 : vector<1x24xf32> to vector<32x24xf32>
    %22 = arith.addf %20, %21 : vector<32x24xf32>
    %23 = arith.truncf %22 : vector<32x24xf32> to vector<32x24xbf16>
    %c0_9 = arith.constant 0 : index
    %c0_10 = arith.constant 0 : index
    %24 = vector.load %arg6[%c0_9, %c0_10] : memref<24x32xbf16, #tpu.memory_space<vmem>>, vector<24x32xbf16>
    %cst_11 = arith.constant dense<0.000000e+00> : vector<32x32xf32>
    %25 = tpu.matmul %23, %24, %cst_11 {dimension_numbers = #tpu.dot_dimension_numbers<[1], [0], [0], [1], [0, 0, 1, 1], [], []>} : vector<32x24xbf16>, vector<24x32xbf16>, vector<32x32xf32> -> vector<32x32xf32>
    %c0_12 = arith.constant 0 : index
    %c0_13 = arith.constant 0 : index
    %26 = vector.load %arg7[%c0_12, %c0_13] : memref<1x32xf32, #tpu.memory_space<vmem>>, vector<1x32xf32>
    %27 = vector.broadcast %26 : vector<1x32xf32> to vector<32x32xf32>
    %28 = arith.addf %25, %27 : vector<32x32xf32>
    %cst_14 = arith.constant 0.000000e+00 : f32
    %29 = vector.broadcast %cst_14 : f32 to vector<32x32xf32>
    %30 = arith.maximumf %28, %29 : vector<32x32xf32>
    %c0_15 = arith.constant 0 : index
    %c0_16 = arith.constant 0 : index
    %31 = vector.load %arg8[%c0_15, %c0_16] : memref<1x32xf32, #tpu.memory_space<vmem>>, vector<1x32xf32>
    %c0_17 = arith.constant 0 : index
    %c0_18 = arith.constant 0 : index
    %32 = vector.load %arg9[%c0_17, %c0_18] : memref<1x32xf32, #tpu.memory_space<vmem>>, vector<1x32xf32>
    %cst_19 = arith.constant dense<0.000000e+00> : vector<32xf32>
    %33 = vector.multi_reduction <add>, %30, %cst_19 [1] : vector<32x32xf32> to vector<32xf32>
    %34 = vector.shape_cast %33 : vector<32xf32> to vector<32x1xf32>
    %cst_20 = arith.constant 3.200000e+01 : f32
    %35 = vector.broadcast %cst_20 : f32 to vector<32x1xf32>
    %36 = arith.divf %34, %35 : vector<32x1xf32>
    %37 = vector.broadcast %36 : vector<32x1xf32> to vector<32x32xf32>
    %38 = arith.subf %30, %37 : vector<32x32xf32>
    %39 = arith.mulf %38, %38 : vector<32x32xf32>
    %cst_21 = arith.constant dense<0.000000e+00> : vector<32xf32>
    %40 = vector.multi_reduction <add>, %39, %cst_21 [1] : vector<32x32xf32> to vector<32xf32>
    %41 = vector.shape_cast %40 : vector<32xf32> to vector<32x1xf32>
    %cst_22 = arith.constant 3.200000e+01 : f32
    %42 = vector.broadcast %cst_22 : f32 to vector<32x1xf32>
    %43 = arith.divf %41, %42 : vector<32x1xf32>
    %cst_23 = arith.constant 9.99999974E-6 : f32
    %44 = vector.broadcast %cst_23 : f32 to vector<32x1xf32>
    %45 = arith.addf %43, %44 : vector<32x1xf32>
    %46 = math.rsqrt %45 : vector<32x1xf32>
    %47 = vector.broadcast %46 : vector<32x1xf32> to vector<32x32xf32>
    %48 = arith.mulf %38, %47 : vector<32x32xf32>
    %49 = vector.broadcast %31 : vector<1x32xf32> to vector<32x32xf32>
    %50 = arith.mulf %48, %49 : vector<32x32xf32>
    %51 = vector.broadcast %32 : vector<1x32xf32> to vector<32x32xf32>
    %52 = arith.addf %50, %51 : vector<32x32xf32>
    %53 = arith.truncf %52 : vector<32x32xf32> to vector<32x32xbf16>
    %c0_24 = arith.constant 0 : index
    %c0_25 = arith.constant 0 : index
    %54 = vector.load %arg10[%c0_24, %c0_25] : memref<32x32xbf16, #tpu.memory_space<vmem>>, vector<32x32xbf16>
    %cst_26 = arith.constant dense<0.000000e+00> : vector<32x32xf32>
    %55 = tpu.matmul %53, %54, %cst_26 {dimension_numbers = #tpu.dot_dimension_numbers<[1], [0], [0], [1], [0, 0, 1, 1], [], []>} : vector<32x32xbf16>, vector<32x32xbf16>, vector<32x32xf32> -> vector<32x32xf32>
    %c0_27 = arith.constant 0 : index
    %c0_28 = arith.constant 0 : index
    %56 = vector.load %arg11[%c0_27, %c0_28] : memref<1x32xf32, #tpu.memory_space<vmem>>, vector<1x32xf32>
    %57 = vector.broadcast %56 : vector<1x32xf32> to vector<32x32xf32>
    %58 = arith.addf %55, %57 : vector<32x32xf32>
    %cst_29 = arith.constant 0.000000e+00 : f32
    %59 = vector.broadcast %cst_29 : f32 to vector<32x32xf32>
    %60 = arith.maximumf %58, %59 : vector<32x32xf32>
    %c0_30 = arith.constant 0 : index
    %c0_31 = arith.constant 0 : index
    %61 = vector.load %arg12[%c0_30, %c0_31] : memref<1x32xf32, #tpu.memory_space<vmem>>, vector<1x32xf32>
    %c0_32 = arith.constant 0 : index
    %c0_33 = arith.constant 0 : index
    %62 = vector.load %arg13[%c0_32, %c0_33] : memref<1x32xf32, #tpu.memory_space<vmem>>, vector<1x32xf32>
    %cst_34 = arith.constant dense<0.000000e+00> : vector<32xf32>
    %63 = vector.multi_reduction <add>, %60, %cst_34 [1] : vector<32x32xf32> to vector<32xf32>
    %64 = vector.shape_cast %63 : vector<32xf32> to vector<32x1xf32>
    %cst_35 = arith.constant 3.200000e+01 : f32
    %65 = vector.broadcast %cst_35 : f32 to vector<32x1xf32>
    %66 = arith.divf %64, %65 : vector<32x1xf32>
    %67 = vector.broadcast %66 : vector<32x1xf32> to vector<32x32xf32>
    %68 = arith.subf %60, %67 : vector<32x32xf32>
    %69 = arith.mulf %68, %68 : vector<32x32xf32>
    %cst_36 = arith.constant dense<0.000000e+00> : vector<32xf32>
    %70 = vector.multi_reduction <add>, %69, %cst_36 [1] : vector<32x32xf32> to vector<32xf32>
    %71 = vector.shape_cast %70 : vector<32xf32> to vector<32x1xf32>
    %cst_37 = arith.constant 3.200000e+01 : f32
    %72 = vector.broadcast %cst_37 : f32 to vector<32x1xf32>
    %73 = arith.divf %71, %72 : vector<32x1xf32>
    %cst_38 = arith.constant 9.99999974E-6 : f32
    %74 = vector.broadcast %cst_38 : f32 to vector<32x1xf32>
    %75 = arith.addf %73, %74 : vector<32x1xf32>
    %76 = math.rsqrt %75 : vector<32x1xf32>
    %77 = vector.broadcast %76 : vector<32x1xf32> to vector<32x32xf32>
    %78 = arith.mulf %68, %77 : vector<32x32xf32>
    %79 = vector.broadcast %61 : vector<1x32xf32> to vector<32x32xf32>
    %80 = arith.mulf %78, %79 : vector<32x32xf32>
    %81 = vector.broadcast %62 : vector<1x32xf32> to vector<32x32xf32>
    %82 = arith.addf %80, %81 : vector<32x32xf32>
    %c0_39 = arith.constant 0 : index
    %c0_40 = arith.constant 0 : index
    %83 = vector.load %arg2[%c0_39, %c0_40] : memref<32x32xf32, #tpu.memory_space<vmem>>, vector<32x32xf32>
    %c0_41 = arith.constant 0 : index
    %c0_42 = arith.constant 0 : index
    %84 = vector.load %arg3[%c0_41, %c0_42] : memref<32x1xf32, #tpu.memory_space<vmem>>, vector<32x1xf32>
    %85 = vector.broadcast %84 : vector<32x1xf32> to vector<32x32xf32>
    %86 = arith.mulf %83, %85 : vector<32x32xf32>
    %87 = tpu.concatenate %82, %86 in 1 : vector<32x32xf32>, vector<32x32xf32> -> vector<32x64xf32>
    %88 = arith.truncf %87 : vector<32x64xf32> to vector<32x64xbf16>
    %c0_43 = arith.constant 0 : index
    %c0_44 = arith.constant 0 : index
    %89 = vector.load %arg14[%c0_43, %c0_44] : memref<64x128xbf16, #tpu.memory_space<vmem>>, vector<64x128xbf16>
    %cst_45 = arith.constant dense<0.000000e+00> : vector<32x128xf32>
    %90 = tpu.matmul %88, %89, %cst_45 {dimension_numbers = #tpu.dot_dimension_numbers<[1], [0], [0], [1], [0, 0, 1, 1], [], []>} : vector<32x64xbf16>, vector<64x128xbf16>, vector<32x128xf32> -> vector<32x128xf32>
    %c0_46 = arith.constant 0 : index
    %c0_47 = arith.constant 0 : index
    %91 = vector.load %arg15[%c0_46, %c0_47] : memref<1x128xf32, #tpu.memory_space<vmem>>, vector<1x128xf32>
    %92 = vector.broadcast %91 : vector<1x128xf32> to vector<32x128xf32>
    %93 = arith.addf %90, %92 : vector<32x128xf32>
    %94 = vector.extract_strided_slice %93 {offsets = [0, 0], sizes = [32, 32], strides = [1, 1]} : vector<32x128xf32> to vector<32x32xf32>
    %95 = arith.negf %94 : vector<32x32xf32>
    %96 = math.exp %95 : vector<32x32xf32>
    %cst_48 = arith.constant 1.000000e+00 : f32
    %97 = vector.broadcast %cst_48 : f32 to vector<32x32xf32>
    %98 = arith.addf %97, %96 : vector<32x32xf32>
    %99 = arith.divf %97, %98 : vector<32x32xf32>
    %100 = vector.extract_strided_slice %93 {offsets = [0, 32], sizes = [32, 32], strides = [1, 1]} : vector<32x128xf32> to vector<32x32xf32>
    %101 = arith.negf %100 : vector<32x32xf32>
    %102 = math.exp %101 : vector<32x32xf32>
    %cst_49 = arith.constant 1.000000e+00 : f32
    %103 = vector.broadcast %cst_49 : f32 to vector<32x32xf32>
    %104 = arith.addf %103, %102 : vector<32x32xf32>
    %105 = arith.divf %103, %104 : vector<32x32xf32>
    %106 = vector.extract_strided_slice %93 {offsets = [0, 64], sizes = [32, 32], strides = [1, 1]} : vector<32x128xf32> to vector<32x32xf32>
    %107 = vector.extract_strided_slice %93 {offsets = [0, 96], sizes = [32, 32], strides = [1, 1]} : vector<32x128xf32> to vector<32x32xf32>
    %108 = arith.mulf %99, %107 : vector<32x32xf32>
    %109 = arith.addf %106, %108 : vector<32x32xf32>
    %110 = math.tanh %109 : vector<32x32xf32>
    %cst_50 = arith.constant 1.000000e+00 : f32
    %111 = vector.broadcast %cst_50 : f32 to vector<32x32xf32>
    %112 = arith.subf %111, %105 : vector<32x32xf32>
    %113 = arith.mulf %112, %110 : vector<32x32xf32>
    %114 = arith.mulf %105, %86 : vector<32x32xf32>
    %115 = arith.addf %113, %114 : vector<32x32xf32>
    %c0_51 = arith.constant 0 : index
    %c0_52 = arith.constant 0 : index
    %116 = vector.load %arg21[%c0_51, %c0_52] : memref<32x32xf32, #tpu.memory_space<vmem>>, vector<32x32xf32>
    tpu.vector_store %arg21[%c0_51, %c0_52], %115 {strides = array<i32>} : memref<32x32xf32, #tpu.memory_space<vmem>>, vector<32x32xf32>,
    %c0_53 = arith.constant 0 : index
    %c0_54 = arith.constant 0 : index
    %117 = vector.load %arg16[%c0_53, %c0_54] : memref<1x32xf32, #tpu.memory_space<vmem>>, vector<1x32xf32>
    %c0_55 = arith.constant 0 : index
    %c0_56 = arith.constant 0 : index
    %118 = vector.load %arg17[%c0_55, %c0_56] : memref<1x32xf32, #tpu.memory_space<vmem>>, vector<1x32xf32>
    %cst_57 = arith.constant dense<0.000000e+00> : vector<32xf32>
    %119 = vector.multi_reduction <add>, %115, %cst_57 [1] : vector<32x32xf32> to vector<32xf32>
    %120 = vector.shape_cast %119 : vector<32xf32> to vector<32x1xf32>
    %cst_58 = arith.constant 3.200000e+01 : f32
    %121 = vector.broadcast %cst_58 : f32 to vector<32x1xf32>
    %122 = arith.divf %120, %121 : vector<32x1xf32>
    %123 = vector.broadcast %122 : vector<32x1xf32> to vector<32x32xf32>
    %124 = arith.subf %115, %123 : vector<32x32xf32>
    %125 = arith.mulf %124, %124 : vector<32x32xf32>
    %cst_59 = arith.constant dense<0.000000e+00> : vector<32xf32>
    %126 = vector.multi_reduction <add>, %125, %cst_59 [1] : vector<32x32xf32> to vector<32xf32>
    %127 = vector.shape_cast %126 : vector<32xf32> to vector<32x1xf32>
    %cst_60 = arith.constant 3.200000e+01 : f32
    %128 = vector.broadcast %cst_60 : f32 to vector<32x1xf32>
    %129 = arith.divf %127, %128 : vector<32x1xf32>
    %cst_61 = arith.constant 9.99999974E-6 : f32
    %130 = vector.broadcast %cst_61 : f32 to vector<32x1xf32>
    %131 = arith.addf %129, %130 : vector<32x1xf32>
    %132 = math.rsqrt %131 : vector<32x1xf32>
    %133 = vector.broadcast %132 : vector<32x1xf32> to vector<32x32xf32>
    %134 = arith.mulf %124, %133 : vector<32x32xf32>
    %135 = vector.broadcast %117 : vector<1x32xf32> to vector<32x32xf32>
    %136 = arith.mulf %134, %135 : vector<32x32xf32>
    %137 = vector.broadcast %118 : vector<1x32xf32> to vector<32x32xf32>
    %138 = arith.addf %136, %137 : vector<32x32xf32>
    %c0_62 = arith.constant 0 : index
    %c0_63 = arith.constant 0 : index
    %139 = vector.load %arg18[%c0_62, %c0_63] : memref<1x32xf32, #tpu.memory_space<vmem>>, vector<1x32xf32>
    %140 = vector.broadcast %139 : vector<1x32xf32> to vector<32x32xf32>
    %141 = arith.mulf %138, %140 : vector<32x32xf32>
    %cst_64 = arith.constant dense<0.000000e+00> : vector<32xf32>
    %142 = vector.multi_reduction <add>, %141, %cst_64 [1] : vector<32x32xf32> to vector<32xf32>
    %143 = vector.shape_cast %142 : vector<32xf32> to vector<32x1xf32>
    %c0_65 = arith.constant 0 : index
    %c0_66 = arith.constant 0 : index
    %144 = vector.load %arg19[%c0_65, %c0_66] : memref<1x1xf32, #tpu.memory_space<vmem>>, vector<1x1xf32>
    %145 = vector.broadcast %144 : vector<1x1xf32> to vector<32x1xf32>
    %146 = arith.addf %143, %145 : vector<32x1xf32>
    %c0_67 = arith.constant 0 : index
    %c0_68 = arith.constant 0 : index
    %147 = vector.load %arg20[%c0_67, %c0_68] : memref<32x1xf32, #tpu.memory_space<vmem>>, vector<32x1xf32>
    tpu.vector_store %arg20[%c0_67, %c0_68], %146 {strides = array<i32>} : memref<32x1xf32, #tpu.memory_space<vmem>>, vector<32x1xf32>,
    return
  }
  func.func @transform_0(%arg0: i32) -> (i32, i32) {
    %c0_i32 = arith.constant 0 : i32
    %c0_i32_0 = arith.constant 0 : i32
    return %arg0, %c0_i32 : i32, i32
  }
  func.func @transform_1(%arg0: i32) -> (i32, i32) {
    %c0_i32 = arith.constant 0 : i32
    %c0_i32_0 = arith.constant 0 : i32
    return %arg0, %c0_i32 : i32, i32
  }
  func.func @transform_2(%arg0: i32) -> (i32, i32) {
    %c0_i32 = arith.constant 0 : i32
    %c0_i32_0 = arith.constant 0 : i32
    return %arg0, %c0_i32 : i32, i32
  }
  func.func @transform_3(%arg0: i32) -> (i32, i32) {
    %c0_i32 = arith.constant 0 : i32
    %c0_i32_0 = arith.constant 0 : i32
    %c0_i32_1 = arith.constant 0 : i32
    return %c0_i32, %c0_i32_0 : i32, i32
  }
  func.func @transform_4(%arg0: i32) -> (i32, i32) {
    %c0_i32 = arith.constant 0 : i32
    %c0_i32_0 = arith.constant 0 : i32
    %c0_i32_1 = arith.constant 0 : i32
    return %c0_i32, %c0_i32_0 : i32, i32
  }
  func.func @transform_5(%arg0: i32) -> (i32, i32) {
    %c0_i32 = arith.constant 0 : i32
    %c0_i32_0 = arith.constant 0 : i32
    %c0_i32_1 = arith.constant 0 : i32
    return %c0_i32, %c0_i32_0 : i32, i32
  }
  func.func @transform_6(%arg0: i32) -> (i32, i32) {
    %c0_i32 = arith.constant 0 : i32
    %c0_i32_0 = arith.constant 0 : i32
    %c0_i32_1 = arith.constant 0 : i32
    return %c0_i32, %c0_i32_0 : i32, i32
  }
  func.func @transform_7(%arg0: i32) -> (i32, i32) {
    %c0_i32 = arith.constant 0 : i32
    %c0_i32_0 = arith.constant 0 : i32
    %c0_i32_1 = arith.constant 0 : i32
    return %c0_i32, %c0_i32_0 : i32, i32
  }
  func.func @transform_8(%arg0: i32) -> (i32, i32) {
    %c0_i32 = arith.constant 0 : i32
    %c0_i32_0 = arith.constant 0 : i32
    %c0_i32_1 = arith.constant 0 : i32
    return %c0_i32, %c0_i32_0 : i32, i32
  }
  func.func @transform_9(%arg0: i32) -> (i32, i32) {
    %c0_i32 = arith.constant 0 : i32
    %c0_i32_0 = arith.constant 0 : i32
    %c0_i32_1 = arith.constant 0 : i32
    return %c0_i32, %c0_i32_0 : i32, i32
  }
  func.func @transform_10(%arg0: i32) -> (i32, i32) {
    %c0_i32 = arith.constant 0 : i32
    %c0_i32_0 = arith.constant 0 : i32
    %c0_i32_1 = arith.constant 0 : i32
    return %c0_i32, %c0_i32_0 : i32, i32
  }
  func.func @transform_11(%arg0: i32) -> (i32, i32) {
    %c0_i32 = arith.constant 0 : i32
    %c0_i32_0 = arith.constant 0 : i32
    %c0_i32_1 = arith.constant 0 : i32
    return %c0_i32, %c0_i32_0 : i32, i32
  }
  func.func @transform_12(%arg0: i32) -> (i32, i32) {
    %c0_i32 = arith.constant 0 : i32
    %c0_i32_0 = arith.constant 0 : i32
    %c0_i32_1 = arith.constant 0 : i32
    return %c0_i32, %c0_i32_0 : i32, i32
  }
  func.func @transform_13(%arg0: i32) -> (i32, i32) {
    %c0_i32 = arith.constant 0 : i32
    %c0_i32_0 = arith.constant 0 : i32
    %c0_i32_1 = arith.constant 0 : i32
    return %c0_i32, %c0_i32_0 : i32, i32
  }
  func.func @transform_14(%arg0: i32) -> (i32, i32) {
    %c0_i32 = arith.constant 0 : i32
    %c0_i32_0 = arith.constant 0 : i32
    %c0_i32_1 = arith.constant 0 : i32
    return %c0_i32, %c0_i32_0 : i32, i32
  }
  func.func @transform_15(%arg0: i32) -> (i32, i32) {
    %c0_i32 = arith.constant 0 : i32
    %c0_i32_0 = arith.constant 0 : i32
    %c0_i32_1 = arith.constant 0 : i32
    return %c0_i32, %c0_i32_0 : i32, i32
  }
  func.func @transform_16(%arg0: i32) -> (i32, i32) {
    %c0_i32 = arith.constant 0 : i32
    %c0_i32_0 = arith.constant 0 : i32
    %c0_i32_1 = arith.constant 0 : i32
    return %c0_i32, %c0_i32_0 : i32, i32
  }
  func.func @transform_17(%arg0: i32) -> (i32, i32) {
    %c0_i32 = arith.constant 0 : i32
    %c0_i32_0 = arith.constant 0 : i32
    %c0_i32_1 = arith.constant 0 : i32
    return %c0_i32, %c0_i32_0 : i32, i32
  }
  func.func @transform_18(%arg0: i32) -> (i32, i32) {
    %c0_i32 = arith.constant 0 : i32
    %c0_i32_0 = arith.constant 0 : i32
    %c0_i32_1 = arith.constant 0 : i32
    return %c0_i32, %c0_i32_0 : i32, i32
  }
  func.func @transform_19(%arg0: i32) -> (i32, i32) {
    %c0_i32 = arith.constant 0 : i32
    %c0_i32_0 = arith.constant 0 : i32
    return %arg0, %c0_i32 : i32, i32
  }
  func.func @transform_20(%arg0: i32) -> (i32, i32) {
    %c0_i32 = arith.constant 0 : i32
    %c0_i32_0 = arith.constant 0 : i32
    return %arg0, %c0_i32 : i32, i32
  }
}

</mosaic_0001>

<bundles_post_ra>
// kernel: tpu_custom_call.1
= control target key start
LH: loop header
LB: loop body
LE: loop exit
PB: predicated region body
PF: predicated region fallthrough
CT: control target
= control target key end

     0   :  { %s1915_s23 = smov 0   ;;  %s2124_s0 = inlined_call_operand.vmem [shape: f32[96,24], index: 0, kind: input, shape index: {}]   ;;  %s2125_s1 = inlined_call_operand.vmem [shape: f32[96,32], index: 1, kind: input, shape index: {}]   ;;  %s2126_s2 = inlined_call_operand.vmem [shape: f32[96,1], index: 2, kind: input, shape index: {}]   ;;  %s2127_s3 = inlined_call_operand.vmem [shape: f32[1,24], index: 3, kind: input, shape index: {}]   ;;  %s2128_s4 = inlined_call_operand.vmem [shape: f32[1,24], index: 4, kind: input, shape index: {}]   ;;  %s2129_s5 = inlined_call_operand.vmem [shape: bf16[24,32], index: 5, kind: input, shape index: {}]   ;;  %s2130_s6 = inlined_call_operand.vmem [shape: f32[1,32], index: 6, kind: input, shape index: {}]   ;;  %s2131_s7 = inlined_call_operand.vmem [shape: f32[1,32], index: 7, kind: input, shape index: {}]   ;;  %s2132_s8 = inlined_call_operand.vmem [shape: f32[1,32], index: 8, kind: input, shape index: {}]   ;;  %s2133_s9 = inlined_call_operand.vmem [shape: bf16[32,32], index: 9, kind: input, shape index: {}]   ;;  %s2134_s10 = inlined_call_operand.vmem [shape: f32[1,32], index: 10, kind: input, shape index: {}]   ;;  %s2135_s11 = inlined_call_operand.vmem [shape: f32[1,32], index: 11, kind: input, shape index: {}]   ;;  %s2136_s12 = inlined_call_operand.vmem [shape: f32[1,32], index: 12, kind: input, shape index: {}]   ;;  %s2137_s13 = inlined_call_operand.vmem [shape: bf16[64,128], index: 13, kind: input, shape index: {}]   ;;  %s2138_s14 = inlined_call_operand.vmem [shape: f32[1,128], index: 14, kind: input, shape index: {}]   ;;  %s2139_s15 = inlined_call_operand.vmem [shape: f32[1,32], index: 15, kind: input, shape index: {}]   ;;  %s2140_s16 = inlined_call_operand.vmem [shape: f32[1,32], index: 16, kind: input, shape index: {}]   ;;  %s2141_s17 = inlined_call_operand.vmem [shape: f32[1,32], index: 17, kind: input, shape index: {}]   ;;  %s2142_s18 = inlined_call_operand.<no memory space> [shape: f32[1,1], index: 18, kind: input, shape index: {}]   ;;  %s2143_s19 = inlined_call_operand.vmem [shape: f32[96,1], index: 19, kind: output, shape index: {0}]   ;;  %s2144_s20 = inlined_call_operand.vmem [shape: f32[96,32], index: 20, kind: output, shape index: {1}]  }
   0x1   :  { %2145 = sst [smem:[#allocation3_spill]] %s2124_s0  ;;  %v26_v0 = vstv %s2142_s18 }
   0x2   :  { %2146 = sst [smem:[#allocation4_spill]] %s2125_s1  ;;  %27 = vst [vmem:[#allocation2] sm:$0x1] %v26_v0 }
   0x3   :  { %2147 = sst [smem:[#allocation5_spill]] %s2126_s2 }
   0x4   :  { %2148 = sst [smem:[#allocation6_spill]] %s2127_s3 }
   0x5   :  { %2149 = sst [smem:[#allocation7_spill]] %s2128_s4 }
   0x6 LB: > { %s1626_s24 = sadd.s32 4294967295, %s1801_s23   ;;  %p1630_p0 = scmp.ge.s32.totalorder %s1801_s23, 1  ;;  %s1801_s23 = sphi %s1915_s23, %s33_s23  }
   0x7   : > { %p590_p1 = scmp.lt.s32.totalorder %s1801_s23, 4 }
   0x9   : > { %p591_p2 = pnand %p1630_p0, %p590_p1 }
   0xa   : > { %s1631_s2 = sshll.u32 (!%p591_p2), %s1626_s24, 2  ;;  %vm700_vm0 = vcmask (!%p591_p2), 195584   ;;  %s2150_s26 = sld [smem:[#allocation3_spill]] (!%p591_p2)  ;;  %v1731_v29 = vld [vmem:[%s2129_s5] sm:$0xff] (!%p591_p2)   ;;  %v1732_v30 = vld [vmem:[%s2129_s5 + $0x8] ss:$0 sps:$4 sm:$0xff] (!%p591_p2)  }
   0xb   : > { %594 = sbr.rel (%p591_p2) target bundleno = 2823 (0xb07), region = 96  ;;  %p664_p3 = scmp.lt.s32.totalorder (!%p591_p2), %s1631_s2, 11  ;;  %vm801_vm1 = vcmask (!%p591_p2), 1043456   ;;  %1688 = vmatprep.subr.bf16.mxu1 (!%p591_p2), %v1731_v29  ;;  %v1643_v0 = vld [vmem:[%s2130_s6] ss:$0 sm:$0xff] (!%p591_p2)  ;;  %vm860_vm2 = vcmask (!%p591_p2), 261120  }
   0xc   : > { %1689 = vmatpush3.bf16.msra.mxu1 (!%p591_p2), %v1731_v29  ;;  %v803_v31 = vsel (!%p591_p2), %vm801_vm1, %v1732_v30, 0  ;;  %s2151_s1 = sld [smem:[#allocation6_spill]] (!%p591_p2)  ;;  %s2153_s25 = sld [smem:[#allocation5_spill]] (!%p591_p2)  ;;  %vm1185_vm3 = vcmask (!%p591_p2), 523264   ;;  %vm1507_vm4 = vcmask (!%p591_p2), 7168  }
   0xd   : > { %1716 = vmatprep.subr.msk.bf16.mxu1 (!%p591_p2), %vm801_vm1, %v1732_v30  ;;  %s2154_s28 = sld [smem:[#allocation4_spill]] (!%p591_p2)  ;;  %s1804_s29 = smov (!%p591_p2), 32  }
   0xe   : > { %s1805_s0 = smov (!%p591_p2), 64   ;;  %s1806_s21 = smov (!%p591_p2), 96  }
  0x10   : > { %1691 = vmatpush3.bf16.msra.mxu1 (!%p591_p2), %v803_v31 }
  0x12   : > { %s2156_s2 = smov (!%p664_p3, %s1631_s2), 11  ;;  %v1641_v46 = vld [vmem:[%s2151_s1] ss:$0 sm:$0xff] }
  0x13   : > { %s1923_s18 = sshll.u32 %s2156_s2, 3  ;;  %s2152_s2 = sld [smem:[#allocation7_spill]] }
  0x14   : > { %s667_s27 = scalar_lea.vmem %s2150_s26, %s1923_s18  ;;  %s679_s3 = scalar_lea.vmem %s2153_s25, %s1923_s18 }
  0x15   : > { %v694_v1 = vld [vmem:[%s667_s27] sm:$0xff]  ;;  %v696_v2 = vld [vmem:[%s667_s27 + $0x10] sm:$0xff]  ;;  %v695_v3 = vld [vmem:[%s667_s27 + $0x8] sm:$0xff]  ;;  %s673_s4 = scalar_lea.vmem %s2154_s28, %s1923_s18  ;;  %s691_s24 = scalar_lea.vmem %s2144_s20, %s1923_s18 }
  0x16   : > { %v701_v4 = vsel %vm700_vm0, %v694_v1, 0.0  ;;  %v707_v5 = vsel %vm700_vm0, %v696_v2, 0.0  ;;  %v697_v6 = vld [vmem:[%s667_s27 + $0x18] sm:$0xff]  ;;  %v704_v7 = vsel %vm700_vm0, %v695_v3, 0.0  ;;  %s685_s30 = scalar_lea.vmem %s2143_s19, %s1923_s18 }
  0x17   : > { %702 = vadd.xlane.f32.xlu0 %v701_v4  ;;  %708 = vadd.xlane.f32.xlu1 %v707_v5  ;;  %v710_v8 = vsel %vm700_vm0, %v697_v6, 0.0 }
  0x19   : > { %v1642_v52 = vld [vmem:[%s2152_s2] ss:$0 sm:$0xff] }
  0x1b   : > { %705 = vadd.xlane.f32.xlu0 %v704_v7  ;;  %711 = vadd.xlane.f32.xlu1 %v710_v8 }
  0xa4   : > { %v703_v9 = vpop.xlane.xlu0 %702  ;;  %v709_v10 = vpop.xlane.xlu1 %708 }
  0xa5   : > { %v714_v11 = vmul.f32 0.041666668, %v703_v9  ;;  %v716_v12 = vmul.f32 0.041666668, %v709_v10 }
  0xa7   : > { %v718_v13 = vsub.f32 %v694_v1, %v714_v11  ;;  %v720_v14 = vsub.f32 %v696_v2, %v716_v12 }
  0xa8   : > { %v706_v15 = vpop.xlane.xlu0 %705  ;;  %v712_v16 = vpop.xlane.xlu1 %711 }
  0xa9   : > { %v715_v17 = vmul.f32 0.041666668, %v706_v15  ;;  %v717_v18 = vmul.f32 0.041666668, %v712_v16  ;;  %v722_v19 = vmul.f32 %v718_v13, %v718_v13  ;;  %v724_v20 = vmul.f32 %v720_v14, %v720_v14 }
  0xab   : > { %v719_v21 = vsub.f32 %v695_v3, %v715_v17  ;;  %v721_v22 = vsub.f32 %v697_v6, %v717_v18  ;;  %v726_v23 = vsel %vm700_vm0, %v722_v19, 0.0  ;;  %v732_v24 = vsel %vm700_vm0, %v724_v20, 0.0 }
  0xac   : > { %727 = vadd.xlane.f32.xlu0 %v726_v23 }
  0xad   : > { %v723_v25 = vmul.f32 %v719_v21, %v719_v21  ;;  %v725_v26 = vmul.f32 %v721_v22, %v721_v22 }
  0xaf   : > { %v729_v27 = vsel %vm700_vm0, %v723_v25, 0.0  ;;  %v735_v28 = vsel %vm700_vm0, %v725_v26, 0.0 }
  0xb0   : > { %733 = vadd.xlane.f32.xlu0 %v732_v24  ;;  %730 = vadd.xlane.f32.xlu1 %v729_v27 }
  0xb4   : > { %736 = vadd.xlane.f32.xlu1 %v735_v28 }
 0x139   : > { %v728_v32 = vpop.xlane.xlu0 %727 }
 0x13a   : > { %v738_v33 = vmul.f32 0.041666668, %v728_v32 }
 0x13c   : > { %v742_v34 = vadd.f32 1e-05, %v738_v33 }
 0x13d   : > { %v731_v35 = vpop.xlane.xlu1 %730  ;;  %v734_v36 = vpop.xlane.xlu0 %733 }
 0x13e   : > { %1739 = vrsqrt.f32 %v742_v34  ;;  %v739_v37 = vmul.f32 0.041666668, %v731_v35  ;;  %v740_v38 = vmul.f32 0.041666668, %v734_v36 }
 0x140   : > { %v743_v39 = vadd.f32 1e-05, %v739_v37  ;;  %v744_v40 = vadd.f32 1e-05, %v740_v38  ;;  %v1733_v37 = vld [vmem:[%s2133_s9] sm:$0xff]   ;;  %v1734_v38 = vld [vmem:[%s2133_s9 + $0x8] sm:$0xff]  }
 0x141   : > { %v737_v41 = vpop.xlane.xlu1 %736  ;;  %1696 = vmatprep.subr.bf16.mxu1 %v1733_v37 }
 0x142   : > { %1741 = vrsqrt.f32 %v743_v39  ;;  %v741_v42 = vmul.f32 0.041666668, %v737_v41 }
 0x143   : > { %1743 = vrsqrt.f32 %v744_v40 }
 0x144   : > { %v745_v43 = vadd.f32 1e-05, %v741_v42 }
 0x146   : > { %1745 = vrsqrt.f32 %v745_v43 }
 0x148   : > { %v1740_v44 = vpop.eup %1739 }
 0x149   : > { %v750_v45 = vmul.f32 %v1740_v44, %v718_v13 }
 0x14b   : > { %v760_v50 = vmul.f32 %v1641_v46, %v750_v45 }
 0x14c   : > { %v1742_v47 = vpop.eup %1741 }
 0x14d   : > { %v1744_v48 = vpop.eup %1743  ;;  %v751_v49 = vmul.f32 %v1742_v47, %v719_v21  ;;  %v770_v56 = vadd.f32 %v1642_v52, %v760_v50 }
 0x14e   : > { %v752_v51 = vmul.f32 %v1744_v48, %v720_v14 }
 0x14f   : > { %v761_v53 = vmul.f32 %v1641_v46, %v751_v49 }
 0x150   : > { %v1746_v54 = vpop.eup %1745  ;;  %v762_v58 = vmul.f32 %v1641_v46, %v752_v51 }
 0x151   : > { %v753_v55 = vmul.f32 %v1746_v54, %v721_v22  ;;  %v771_v57 = vadd.f32 %v1642_v52, %v761_v53 }
 0x152   : > { %v772_v61 = vadd.f32 %v1642_v52, %v762_v58  ;;  %v1649_v58 = vld [vmem:[%s2132_s8] ss:$0 sm:$0xff] }
 0x153   : > { %v774_v59 = vpack.c.bf16 %v771_v57, %v770_v56  ;;  %v763_v60 = vmul.f32 %v1641_v46, %v753_v55 }
 0x155   : > { %1692 = vmatprep.mubr.msk.bf16.mxu1 %vm700_vm0, %v774_v59  ;;  %v773_v62 = vadd.f32 %v1642_v52, %v763_v60  ;;  %v1648_v52 = vld [vmem:[%s2131_s7] ss:$0 sm:$0xff] }
 0x157   : > { %v775_v63 = vpack.c.bf16 %v773_v62, %v772_v61 }
 0x159   : > { %1693 = vmatmul.mubr.msk.bf16.vlgmr.msra.gmra.mrb[0].mxu1 %vm700_vm0, %v775_v63 }
 0x15a   : > { %1697 = vmatpush3.bf16.msra.mxu1 %v1733_v37 }
 0x15b   : > { %1698 = vmatprep.subr.bf16.mxu1 %v1734_v38 }
 0x15e   : > { %1699 = vmatpush3.bf16.msra.mxu1 %v1734_v38 }
 0x22c   : > { %v1694_v1 = vpop.f32.mrb[0].mxu1 }
 0x22d   : > { %v839_v2 = vpop.f32.mrb[1].mxu1  ;;  %v848_v3 = vadd.f32 %v1694_v1, %v1643_v0 }
 0x22e   : > { %v840_v4 = vadd.f32 %v1643_v0, %v839_v2  ;;  %v1695_v5 = vpop.f32.mrb[2].mxu1 }
 0x22f   : > { %v842_v6 = vpop.f32.mrb[3].mxu1  ;;  %v851_v8 = vadd.f32 %v1695_v5, %v1643_v0  ;;  %v856_v10 = vmax.f32 %v848_v3, 0.0 }
 0x230   : > { %v854_v7 = vmax.f32 %v840_v4, 0.0  ;;  %v843_v9 = vadd.f32 %v1643_v0, %v842_v6 }
 0x231   : > { %v857_v13 = vmax.f32 %v851_v8, 0.0  ;;  %v867_v15 = vsel %vm860_vm2, %v856_v10, 0.0  ;;  %v1650_v8 = vld [vmem:[%s2134_s10] ss:$0 sm:$0xff] }
 0x232   : > { %v855_v11 = vmax.f32 %v843_v9, 0.0  ;;  %v861_v12 = vsel %vm860_vm2, %v854_v7, 0.0 }
 0x233   : > { %862 = vadd.xlane.f32.xlu0 %v861_v12  ;;  %v870_v16 = vsel %vm860_vm2, %v857_v13, 0.0 }
 0x234   : > { %v864_v14 = vsel %vm860_vm2, %v855_v11, 0.0 }
 0x235   : > { %865 = vadd.xlane.f32.xlu1 %v864_v14 }
 0x237   : > { %868 = vadd.xlane.f32.xlu0 %v867_v15 }
 0x239   : > { %871 = vadd.xlane.f32.xlu1 %v870_v16 }
 0x2c0   : > { %v863_v17 = vpop.xlane.xlu0 %862 }
 0x2c1   : > { %v874_v18 = vmul.f32 0.03125, %v863_v17 }
 0x2c2   : > { %v866_v19 = vpop.xlane.xlu1 %865 }
 0x2c3   : > { %v878_v20 = vsub.f32 %v854_v7, %v874_v18  ;;  %v875_v21 = vmul.f32 0.03125, %v866_v19  ;;  %v1803_v7 = vmov 0  }
 0x2c4   : > { %v869_v22 = vpop.xlane.xlu0 %868  ;;  %1730 = vset.pattern.permute.xlu1 %v1803_v7  ;;  %1729 = vset.pattern.permute.xlu0 %v1803_v7 }
 0x2c5   : > { %v879_v23 = vsub.f32 %v855_v11, %v875_v21  ;;  %v876_v24 = vmul.f32 0.03125, %v869_v22  ;;  %v882_v25 = vmul.f32 %v878_v20, %v878_v20 }
 0x2c6   : > { %v872_v26 = vpop.xlane.xlu1 %871 }
 0x2c7   : > { %v880_v27 = vsub.f32 %v856_v10, %v876_v24  ;;  %v877_v28 = vmul.f32 0.03125, %v872_v26  ;;  %v886_v29 = vsel %vm860_vm2, %v882_v25, 0.0  ;;  %v883_v30 = vmul.f32 %v879_v23, %v879_v23  ;;  %v1097_v25 = vld [vmem:[%s679_s3 + $0x8] sm:$0xff]  ;;  %v1096_v26 = vld [vmem:[%s679_s3] sm:$0xff] }
 0x2c8   : > { %887 = vadd.xlane.f32.xlu0 %v886_v29 }
 0x2c9   : > { %v881_v31 = vsub.f32 %v857_v13, %v877_v28  ;;  %v889_v32 = vsel %vm860_vm2, %v883_v30, 0.0  ;;  %v884_v33 = vmul.f32 %v880_v27, %v880_v27  ;;  %v1099_v28 = vld [vmem:[%s679_s3 + $0x18] sm:$0xff] }
 0x2ca   : > { %890 = vadd.xlane.f32.xlu1 %v889_v32 }
 0x2cb   : > { %v892_v34 = vsel %vm860_vm2, %v884_v33, 0.0  ;;  %v885_v35 = vmul.f32 %v881_v31, %v881_v31 }
 0x2cc   : > { %893 = vadd.xlane.f32.xlu0 %v892_v34 }
 0x2cd   : > { %v895_v36 = vsel %vm860_vm2, %v885_v35, 0.0 }
 0x2ce   : > { %896 = vadd.xlane.f32.xlu1 %v895_v36 }
 0x355   : > { %v888_v39 = vpop.xlane.xlu0 %887 }
 0x356   : > { %v898_v40 = vmul.f32 0.03125, %v888_v39 }
 0x357   : > { %v891_v41 = vpop.xlane.xlu1 %890 }
 0x358   : > { %v902_v42 = vadd.f32 1e-05, %v898_v40  ;;  %v899_v43 = vmul.f32 0.03125, %v891_v41 }
 0x359   : > { %v894_v44 = vpop.xlane.xlu0 %893 }
 0x35a   : > { %1747 = vrsqrt.f32 %v902_v42  ;;  %v903_v45 = vadd.f32 1e-05, %v899_v43  ;;  %v900_v46 = vmul.f32 0.03125, %v894_v44 }
 0x35b   : > { %v897_v47 = vpop.xlane.xlu1 %896 }
 0x35c   : > { %1749 = vrsqrt.f32 %v903_v45  ;;  %v904_v48 = vadd.f32 1e-05, %v900_v46  ;;  %v901_v49 = vmul.f32 0.03125, %v897_v47 }
 0x35e   : > { %1751 = vrsqrt.f32 %v904_v48  ;;  %v905_v50 = vadd.f32 1e-05, %v901_v49 }
 0x360   : > { %1753 = vrsqrt.f32 %v905_v50  ;;  %v1093_v50 = vld [vmem:[%s673_s4 + $0x8] sm:$0xff] }
 0x364   : > { %v1748_v51 = vpop.eup %1747 }
 0x365   : > { %v910_v53 = vmul.f32 %v1748_v51, %v878_v20  ;;  %v1092_v51 = vld [vmem:[%s673_s4] sm:$0xff] }
 0x366   : > { %v1750_v54 = vpop.eup %1749 }
 0x367   : > { %v911_v55 = vmul.f32 %v1750_v54, %v879_v23  ;;  %v920_v56 = vmul.f32 %v1648_v52, %v910_v53 }
 0x368   : > { %v1752_v57 = vpop.eup %1751 }
 0x369   : > { %v912_v59 = vmul.f32 %v1752_v57, %v880_v27  ;;  %v921_v60 = vmul.f32 %v1648_v52, %v911_v55  ;;  %v930_v0 = vadd.f32 %v1649_v58, %v920_v56  ;;  %v1098_v27 = vld [vmem:[%s679_s3 + $0x10] sm:$0xff] }
 0x36a   : > { %v1754_v61 = vpop.eup %1753  ;;  %v1094_v56 = vld [vmem:[%s673_s4 + $0x10] sm:$0xff] }
 0x36b   : > { %v922_v62 = vmul.f32 %v1648_v52, %v912_v59  ;;  %v913_v63 = vmul.f32 %v1754_v61, %v881_v31  ;;  %v931_v1 = vadd.f32 %v1649_v58, %v921_v60  ;;  %v1735_v61 = vld [vmem:[%s2137_s13] sm:$0xff]  }
 0x36c   : > { %1704 = vmatprep.subr.bf16.mxu0 %v1735_v61 }
 0x36d   : > { %v923_v2 = vmul.f32 %v1648_v52, %v913_v63  ;;  %v934_v3 = vpack.c.bf16 %v931_v1, %v930_v0  ;;  %v932_v4 = vadd.f32 %v1649_v58, %v922_v62  ;;  %1705 = vmatpush3.bf16.msra.mxu0 %v1735_v61  ;;  %v1736_v62 = vld [vmem:[%s2137_s13 + $0x8] sm:$0xff]   ;;  %v1737_v63 = vld [vmem:[%s2137_s13 + $0x10] sm:$0xff]   ;;  %v1738_v0 = vld [vmem:[%s2137_s13 + $0x18] sm:$0xff]  }
 0x36e   : > { %1706 = vmatprep.subr.bf16.mxu0 %v1736_v62 }
 0x36f   : > { %1700 = vmatprep.mubr.msk.bf16.mxu1 %vm860_vm2, %v934_v3  ;;  %v933_v5 = vadd.f32 %v1649_v58, %v923_v2  ;;  %v1095_v58 = vld [vmem:[%s673_s4 + $0x18] sm:$0xff] }
 0x371   : > { %v935_v6 = vpack.c.bf16 %v933_v5, %v932_v4  ;;  %1707 = vmatpush3.bf16.msra.mxu0 %v1736_v62 }
 0x372   : > { %1708 = vmatprep.subr.bf16.mxu0 %v1737_v63 }
 0x373   : > { %1701 = vmatmul.mubr.msk.bf16.vlgmr.msra.gmra.mrb[4].mxu1 %vm860_vm2, %v935_v6 }
 0x375   : > { %1709 = vmatpush3.bf16.msra.mxu0 %v1737_v63 }
 0x376   : > { %1710 = vmatprep.subr.bf16.mxu0 %v1738_v0 }
 0x379   : > { %1711 = vmatpush3.bf16.msra.mxu0 %v1738_v0 }
 0x446   : > { %v1702_v9 = vpop.f32.mrb[4].mxu1 }
 0x447   : > { %v999_v10 = vpop.f32.mrb[5].mxu1  ;;  %v1008_v11 = vadd.f32 %v1702_v9, %v1650_v8 }
 0x448   : > { %v1000_v12 = vadd.f32 %v1650_v8, %v999_v10  ;;  %v1703_v13 = vpop.f32.mrb[6].mxu1 }
 0x449   : > { %v1002_v14 = vpop.f32.mrb[7].mxu1  ;;  %v1011_v16 = vadd.f32 %v1703_v13, %v1650_v8  ;;  %v1016_v18 = vmax.f32 %v1008_v11, 0.0 }
 0x44a   : > { %v1014_v15 = vmax.f32 %v1000_v12, 0.0  ;;  %v1003_v17 = vadd.f32 %v1650_v8, %v1002_v14  ;;  %v1655_v14 = vld [vmem:[%s2135_s11] ss:$0 sm:$0xff] }
 0x44b   : > { %v1017_v21 = vmax.f32 %v1011_v16, 0.0  ;;  %v1026_v23 = vsel %vm860_vm2, %v1016_v18, 0.0 }
 0x44c   : > { %v1015_v19 = vmax.f32 %v1003_v17, 0.0  ;;  %v1020_v20 = vsel %vm860_vm2, %v1014_v15, 0.0  ;;  %v1656_v17 = vld [vmem:[%s2136_s12] ss:$0 sm:$0xff] }
 0x44d   : > { %1021 = vadd.xlane.f32.xlu0 %v1020_v20  ;;  %v1029_v24 = vsel %vm860_vm2, %v1017_v21, 0.0 }
 0x44e   : > { %v1023_v22 = vsel %vm860_vm2, %v1015_v19, 0.0 }
 0x44f   : > { %1024 = vadd.xlane.f32.xlu1 %v1023_v22 }
 0x451   : > { %1027 = vadd.xlane.f32.xlu0 %v1026_v23 }
 0x453   : > { %1030 = vadd.xlane.f32.xlu1 %v1029_v24 }
 0x464   : > { %1107 = vperm.xlu1 %1730, %v1097_v25  }
 0x467   : > { %1102 = vperm.xlu0 %1729, %v1096_v26  }
 0x468   : > { %1112 = vperm.xlu1 %1730, %v1098_v27  }
 0x46c   : > { %1117 = vperm.xlu1 %1730, %v1099_v28  }
 0x4da   : > { %v1022_v29 = vpop.xlane.xlu0 %1021 }
 0x4db   : > { %v1032_v30 = vmul.f32 0.03125, %v1022_v29 }
 0x4dc   : > { %v1025_v31 = vpop.xlane.xlu1 %1024 }
 0x4dd   : > { %v1987_v32 = vsub.f32 %v1014_v15, %v1032_v30  ;;  %v1033_v33 = vmul.f32 0.03125, %v1025_v31 }
 0x4de   : > { %v1028_v34 = vpop.xlane.xlu0 %1027 }
 0x4df   : > { %v1989_v35 = vsub.f32 %v1015_v19, %v1033_v33  ;;  %v1034_v36 = vmul.f32 0.03125, %v1028_v34  ;;  %v1040_v37 = vmul.f32 %v1987_v32, %v1987_v32 }
 0x4e0   : > { %v1031_v38 = vpop.xlane.xlu1 %1030 }
 0x4e1   : > { %v1993_v39 = vsub.f32 %v1016_v18, %v1034_v36  ;;  %v1035_v40 = vmul.f32 0.03125, %v1031_v38  ;;  %v1044_v41 = vsel %vm860_vm2, %v1040_v37, 0.0  ;;  %v1041_v42 = vmul.f32 %v1989_v35, %v1989_v35 }
 0x4e2   : > { %1045 = vadd.xlane.f32.xlu1 %v1044_v41  ;;  %v1657_v41 = vld [vmem:[%s2138_s14] ss:$0 sm:$0xff] }
 0x4e3   : > { %v1998_v43 = vsub.f32 %v1017_v21, %v1035_v40  ;;  %v1047_v44 = vsel %vm860_vm2, %v1041_v42, 0.0  ;;  %v1042_v45 = vmul.f32 %v1993_v39, %v1993_v39 }
 0x4e4   : > { %1048 = vadd.xlane.f32.xlu0 %v1047_v44  ;;  %v1108_v49 = vpop.permute.xlu1 %1107 }
 0x4e5   : > { %v1050_v46 = vsel %vm860_vm2, %v1042_v45, 0.0  ;;  %v1043_v47 = vmul.f32 %v1998_v43, %v1998_v43  ;;  %v1121_v53 = vmul.f32 %v1108_v49, %v1093_v50 }
 0x4e6   : > { %1051 = vadd.xlane.f32.xlu1 %v1050_v46  ;;  %v1103_v52 = vpop.permute.xlu0 %1102 }
 0x4e7   : > { %v1053_v48 = vsel %vm860_vm2, %v1043_v47, 0.0  ;;  %v1120_v55 = vmul.f32 %v1103_v52, %v1092_v51 }
 0x4e8   : > { %v1113_v54 = vpop.permute.xlu1 %1112 }
 0x4e9   : > { %v1122_v57 = vmul.f32 %v1113_v54, %v1094_v56 }
 0x4ea   : > { %1054 = vadd.xlane.f32.xlu1 %v1053_v48 }
 0x4ec   : > { %v1118_v59 = vpop.permute.xlu1 %1117 }
 0x4ed   : > { %v1123_v60 = vmul.f32 %v1118_v59, %v1095_v58 }
 0x4fa   : > { %1130 = vrot.lane.b32.xlu0 %v1121_v53, %s1804_s29 }
 0x4fb   : > { %1128 = vrot.lane.b32.xlu1 %v1120_v55, %s1804_s29 }
 0x4ff   : > { %1132 = vrot.lane.b32.xlu1 %v1122_v57, %s1804_s29 }
 0x503   : > { %1134 = vrot.lane.b32.xlu1 %v1123_v60, %s1804_s29 }
 0x56f   : > { %v1046_v1 = vpop.xlane.xlu1 %1045 }
 0x570   : > { %v1056_v2 = vmul.f32 0.03125, %v1046_v1 }
 0x571   : > { %v1049_v3 = vpop.xlane.xlu0 %1048 }
 0x572   : > { %v1060_v4 = vadd.f32 1e-05, %v1056_v2  ;;  %v1057_v5 = vmul.f32 0.03125, %v1049_v3 }
 0x573   : > { %v1052_v6 = vpop.xlane.xlu1 %1051 }
 0x574   : > { %1755 = vrsqrt.f32 %v1060_v4  ;;  %v1061_v7 = vadd.f32 1e-05, %v1057_v5  ;;  %v1058_v8 = vmul.f32 0.03125, %v1052_v6 }
 0x575   : > { %v2040_v29 = vpop.permute.xlu0 %1130 }
 0x576   : > { %1757 = vrsqrt.f32 %v1061_v7  ;;  %v1062_v9 = vadd.f32 1e-05, %v1058_v8 }
 0x577   : > { %v1055_v10 = vpop.xlane.xlu1 %1054 }
 0x578   : > { %1759 = vrsqrt.f32 %v1062_v9  ;;  %v1059_v11 = vmul.f32 0.03125, %v1055_v10 }
 0x57a   : > { %v1063_v12 = vadd.f32 1e-05, %v1059_v11 }
 0x57b   : > { %v2034_v18 = vpop.permute.xlu1 %1128 }
 0x57c   : > { %1761 = vrsqrt.f32 %v1063_v12 }
 0x57e   : > { %v1756_v13 = vpop.eup %1755 }
 0x57f   : > { %v1068_v15 = vmul.f32 %v1756_v13, %v1987_v32  ;;  %v2038_v28 = vpop.permute.xlu1 %1132 }
 0x580   : > { %v1758_v16 = vpop.eup %1757 }
 0x581   : > { %v1078_v19 = vmul.f32 %v1655_v14, %v1068_v15  ;;  %v1069_v20 = vmul.f32 %v1758_v16, %v1989_v35 }
 0x582   : > { %v1760_v21 = vpop.eup %1759 }
 0x583   : > { %v1088_v22 = vadd.f32 %v1656_v17, %v1078_v19  ;;  %v1070_v23 = vmul.f32 %v1760_v21, %v1993_v39  ;;  %v1079_v24 = vmul.f32 %v1655_v14, %v1069_v20  ;;  %v2047_v37 = vpop.permute.xlu1 %1134 }
 0x585   : > { %v1080_v25 = vmul.f32 %v1655_v14, %v1070_v23  ;;  %v1089_v26 = vadd.f32 %v1656_v17, %v1079_v24  ;;  %v1140_v30 = vsel %vm860_vm2, %v1088_v22, %v2034_v18 }
 0x586   : > { %v1762_v27 = vpop.eup %1761 }
 0x587   : > { %v1071_v31 = vmul.f32 %v1762_v27, %v1998_v43  ;;  %v1141_v32 = vsel %vm860_vm2, %v1089_v26, %v2040_v29  ;;  %v1090_v34 = vadd.f32 %v1656_v17, %v1080_v25 }
 0x588   : > { %v1144_v33 = vpack.c.bf16 %v1141_v32, %v1140_v30 }
 0x589   : > { %v1081_v35 = vmul.f32 %v1655_v14, %v1071_v31  ;;  %v1142_v38 = vsel %vm860_vm2, %v1090_v34, %v2038_v28 }
 0x58a   : > { %1712 = vmatprep.mubr.msk.bf16.mxu0 %vm1185_vm3, %v1144_v33 }
 0x58b   : > { %v1091_v36 = vadd.f32 %v1656_v17, %v1081_v35 }
 0x58d   : > { %v1143_v39 = vsel %vm860_vm2, %v1091_v36, %v2047_v37 }
 0x58e   : > { %v1145_v40 = vpack.c.bf16 %v1143_v39, %v1142_v38 }
 0x590   : > { %1713 = vmatmul.mubr.msk.bf16.vlgmr.msra.gmra.mrb[0].mxu0 %vm1185_vm3, %v1145_v40 }
 0x663   : > { %v1714_v42 = vpop.f32.mrb[0].mxu0 }
 0x664   : > { %v1226_v43 = vpop.f32.mrb[1].mxu0  ;;  %v1235_v48 = vadd.f32 %v1714_v42, %v1657_v41 }
 0x665   : > { %v1227_v44 = vadd.f32 %v1657_v41, %v1226_v43  ;;  %v1715_v45 = vpop.f32.mrb[2].mxu0 }
 0x666   : > { %v1229_v46 = vpop.f32.mrb[3].mxu0  ;;  %v1238_v49 = vadd.f32 %v1715_v45, %v1657_v41  ;;  %v1666_v52 = vmul.f32 -1.442695, %v1235_v48 }
 0x667   : > { %v1230_v47 = vadd.f32 %v1657_v41, %v1229_v46  ;;  %1269 = vrot.lane.b32.xlu1 %v1227_v44, %s1804_s29  ;;  %v1664_v50 = vmul.f32 -1.442695, %v1227_v44 }
 0x668   : > { %v1667_v53 = vmul.f32 -1.442695, %v1238_v49 }
 0x669   : > { %1271 = vrot.lane.b32.xlu0 %v1230_v47, %s1804_s29  ;;  %v1665_v51 = vmul.f32 -1.442695, %v1230_v47  ;;  %1763 = vpow2.f32 %v1664_v50 }
 0x66b   : > { %1273 = vrot.lane.b32.xlu1 %v1235_v48, %s1804_s29  ;;  %1765 = vpow2.f32 %v1665_v51 }
 0x66c   : > { %1767 = vpow2.f32 %v1666_v52 }
 0x66d   : > { %1275 = vrot.lane.b32.xlu0 %v1238_v49, %s1804_s29  ;;  %1769 = vpow2.f32 %v1667_v53 }
 0x673   : > { %v1764_v54 = vpop.eup %1763 }
 0x674   : > { %v1253_v56 = vadd.f32 1.0, %v1764_v54 }
 0x675   : > { %v1766_v55 = vpop.eup %1765 }
 0x676   : > { %v1768_v57 = vpop.eup %1767  ;;  %v1254_v58 = vadd.f32 1.0, %v1766_v55  ;;  %1771 = vrcp.f32 %v1253_v56 }
 0x677   : > { %v1770_v59 = vpop.eup %1769  ;;  %v1255_v60 = vadd.f32 1.0, %v1768_v57 }
 0x678   : > { %v1256_v61 = vadd.f32 1.0, %v1770_v59  ;;  %1773 = vrcp.f32 %v1254_v58 }
 0x679   : > { %1775 = vrcp.f32 %v1255_v60 }
 0x67a   : > { %1777 = vrcp.f32 %v1256_v61 }
 0x680   : > { %v1772_v62 = vpop.eup %1771 }
 0x681   : > { %v1309_v23 = vsub.f32 1.0, %v1772_v62  ;;  %v1333_v25 = vmul.f32 %v1772_v62, %v2034_v18 }
 0x682   : > { %v1774_v1 = vpop.eup %1773 }
 0x683   : > { %v1776_v4 = vpop.eup %1775  ;;  %v1310_v27 = vsub.f32 1.0, %v1774_v1  ;;  %v1334_v32 = vmul.f32 %v1774_v1, %v2040_v29 }
 0x684   : > { %v1778_v7 = vpop.eup %1777  ;;  %v1311_v34 = vsub.f32 1.0, %v1776_v4  ;;  %v1335_v38 = vmul.f32 %v1776_v4, %v2038_v28 }
 0x685   : > { %v1312_v40 = vsub.f32 1.0, %v1778_v7  ;;  %v1336_v18 = vmul.f32 %v1778_v7, %v2047_v37 }
 0x6d9   : > { %v1270_v63 = vpop.permute.xlu1 %1269 }
 0x6da   : > { %v1281_v0 = vmul.f32 %v1772_v62, %v1270_v63 }
 0x6db   : > { %v1272_v2 = vpop.permute.xlu0 %1271 }
 0x6dc   : > { %v1282_v3 = vmul.f32 %v1774_v1, %v1272_v2  ;;  %1289 = vrot.lane.b32.xlu1 %v1281_v0, %s1805_s0 }
 0x6dd   : > { %v1274_v5 = vpop.permute.xlu1 %1273 }
 0x6de   : > { %v1283_v6 = vmul.f32 %v1776_v4, %v1274_v5  ;;  %1291 = vrot.lane.b32.xlu0 %v1282_v3, %s1805_s0 }
 0x6df   : > { %v1276_v8 = vpop.permute.xlu0 %1275 }
 0x6e0   : > { %v1284_v9 = vmul.f32 %v1778_v7, %v1276_v8  ;;  %1293 = vrot.lane.b32.xlu1 %v1283_v6, %s1805_s0 }
 0x6e2   : > { %1295 = vrot.lane.b32.xlu0 %v1284_v9, %s1805_s0 }
 0x74e   : > { %v1290_v10 = vpop.permute.xlu1 %1289 }
 0x74f   : > { %v1301_v11 = vadd.f32 %v1290_v10, %v1227_v44  ;;  %v1669_v10 = vld [vmem:[%s2140_s16] ss:$0 sm:$0xff] }
 0x750   : > { %v1292_v12 = vpop.permute.xlu0 %1291 }
 0x751   : > { %1779 = vtanh.f32 %v1301_v11  ;;  %v1302_v13 = vadd.f32 %v1292_v12, %v1230_v47  ;;  %v1670_v11 = vld [vmem:[%s2141_s17] ss:$0 sm:$0xff] }
 0x752   : > { %v1294_v14 = vpop.permute.xlu1 %1293  ;;  %v1668_v12 = vld [vmem:[%s2139_s15] ss:$0 sm:$0xff] }
 0x753   : > { %1781 = vtanh.f32 %v1302_v13  ;;  %v1303_v15 = vadd.f32 %v1294_v14, %v1235_v48 }
 0x754   : > { %v1296_v16 = vpop.permute.xlu0 %1295 }
 0x755   : > { %1783 = vtanh.f32 %v1303_v15  ;;  %v1304_v17 = vadd.f32 %v1296_v16, %v1238_v49 }
 0x757   : > { %1785 = vtanh.f32 %v1304_v17 }
 0x75b   : > { %v1780_v19 = vpop.eup %1779 }
 0x75c   : > { %1317 = vrot.lane.b32.xlu1 %v1780_v19, %s1806_s21 }
 0x75d   : > { %v1782_v20 = vpop.eup %1781 }
 0x75e   : > { %1319 = vrot.lane.b32.xlu0 %v1782_v20, %s1806_s21 }
 0x75f   : > { %v1784_v21 = vpop.eup %1783 }
 0x760   : > { %1321 = vrot.lane.b32.xlu1 %v1784_v21, %s1806_s21 }
 0x761   : > { %v1786_v22 = vpop.eup %1785 }
 0x762   : > { %1323 = vrot.lane.b32.xlu0 %v1786_v22, %s1806_s21 }
 0x7ce   : > { %v1318_v24 = vpop.permute.xlu1 %1317 }
 0x7cf   : > { %v1329_v26 = vmul.f32 %v1318_v24, %v1309_v23 }
 0x7d0   : > { %v1320_v30 = vpop.permute.xlu0 %1319 }
 0x7d1   : > { %v1337_v31 = vadd.f32 %v1333_v25, %v1329_v26  ;;  %v1330_v33 = vmul.f32 %v1320_v30, %v1310_v27 }
 0x7d2   : > { %v1322_v35 = vpop.permute.xlu1 %1321 }
 0x7d3   : > { %v1338_v36 = vadd.f32 %v1334_v32, %v1330_v33  ;;  %v1331_v39 = vmul.f32 %v1322_v35, %v1311_v34  ;;  %1345 = vrot.lane.b32.xlu1 %v1337_v31, %s1806_s21 }
 0x7d4   : > { %v1324_v41 = vpop.permute.xlu0 %1323 }
 0x7d5   : > { %v1339_v42 = vadd.f32 %v1335_v38, %v1331_v39  ;;  %v1332_v43 = vmul.f32 %v1324_v41, %v1312_v40  ;;  %1347 = vrot.lane.b32.xlu0 %v1338_v36, %s1806_s21 }
 0x7d7   : > { %v1340_v44 = vadd.f32 %v1336_v18, %v1332_v43  ;;  %1349 = vrot.lane.b32.xlu1 %v1339_v42, %s1806_s21 }
 0x7d9   : > { %1351 = vrot.lane.b32.xlu0 %v1340_v44, %s1806_s21 }
 0x845   : > { %v1346_v28 = vpop.permute.xlu1 %1345 }
 0x846   : > { %1357 = vst.msk [vmem:[%s691_s24] sm:$0xff] %vm860_vm2, %v1346_v28  ;;  %v1363_v29 = vsel %vm860_vm2, %v1346_v28, 0.0 }
 0x847   : > { %v1348_v45 = vpop.permute.xlu0 %1347  ;;  %1364 = vadd.xlane.f32.xlu1 %v1363_v29 }
 0x848   : > { %1358 = vst.msk [vmem:[%s691_s24 + $0x8] sm:$0xff] %vm860_vm2, %v1348_v45  ;;  %v1366_v37 = vsel %vm860_vm2, %v1348_v45, 0.0 }
 0x849   : > { %1367 = vadd.xlane.f32.xlu0 %v1366_v37  ;;  %v1350_v46 = vpop.permute.xlu1 %1349 }
 0x84a   : > { %1359 = vst.msk [vmem:[%s691_s24 + $0x10] sm:$0xff] %vm860_vm2, %v1350_v46  ;;  %v1369_v49 = vsel %vm860_vm2, %v1350_v46, 0.0 }
 0x84b   : > { %v1352_v47 = vpop.permute.xlu0 %1351 }
 0x84c   : > { %1360 = vst.msk [vmem:[%s691_s24 + $0x18] sm:$0xff] %vm860_vm2, %v1352_v47  ;;  %v1372_v48 = vsel %vm860_vm2, %v1352_v47, 0.0 }
 0x84d   : > { %1373 = vadd.xlane.f32.xlu1 %v1372_v48  ;;  %1370 = vadd.xlane.f32.xlu0 %v1369_v49 }
 0x8d4   : > { %v1365_v50 = vpop.xlane.xlu1 %1364 }
 0x8d5   : > { %v1375_v51 = vmul.f32 0.03125, %v1365_v50 }
 0x8d6   : > { %v1368_v52 = vpop.xlane.xlu0 %1367 }
 0x8d7   : > { %v1379_v53 = vsub.f32 %v1337_v31, %v1375_v51  ;;  %v1376_v54 = vmul.f32 0.03125, %v1368_v52 }
 0x8d9   : > { %v2084_v55 = vsub.f32 %v1338_v36, %v1376_v54  ;;  %v1383_v56 = vmul.f32 %v1379_v53, %v1379_v53 }
 0x8da   : > { %v1371_v57 = vpop.xlane.xlu0 %1370  ;;  %v1374_v58 = vpop.xlane.xlu1 %1373 }
 0x8db   : > { %v1377_v59 = vmul.f32 0.03125, %v1371_v57  ;;  %v1378_v60 = vmul.f32 0.03125, %v1374_v58  ;;  %1391 = vrot.lane.b32.xlu0 %v1383_v56, %s1806_s21  ;;  %v1384_v61 = vmul.f32 %v2084_v55, %v2084_v55  ;;  %v1671_v56 = vld [vmem:[#allocation2] ss:$0 sm:$0xff] }
 0x8dd   : > { %v1381_v62 = vsub.f32 %v1339_v42, %v1377_v59  ;;  %v1382_v63 = vsub.f32 %v1340_v44, %v1378_v60  ;;  %1393 = vrot.lane.b32.xlu1 %v1384_v61, %s1806_s21 }
 0x8df   : > { %v1385_v0 = vmul.f32 %v1381_v62, %v1381_v62  ;;  %v1386_v1 = vmul.f32 %v1382_v63, %v1382_v63 }
 0x8e1   : > { %1395 = vrot.lane.b32.xlu1 %v1385_v0, %s1806_s21  ;;  %1397 = vrot.lane.b32.xlu0 %v1386_v1, %s1806_s21 }
 0x94d   : > { %v1392_v2 = vpop.permute.xlu0 %1391 }
 0x94e   : > { %v1403_v3 = vsel %vm860_vm2, %v1392_v2, 0.0 }
 0x94f   : > { %1404 = vadd.xlane.f32.xlu1 %v1403_v3  ;;  %v1394_v4 = vpop.permute.xlu1 %1393 }
 0x950   : > { %v1406_v9 = vsel %vm860_vm2, %v1394_v4, 0.0 }
 0x953   : > { %v1398_v5 = vpop.permute.xlu0 %1397  ;;  %v1396_v6 = vpop.permute.xlu1 %1395 }
 0x954   : > { %v1412_v7 = vsel %vm860_vm2, %v1398_v5, 0.0  ;;  %v1409_v8 = vsel %vm860_vm2, %v1396_v6, 0.0 }
 0x955   : > { %1413 = vadd.xlane.f32.xlu1 %v1412_v7  ;;  %1410 = vadd.xlane.f32.xlu0 %v1409_v8 }
 0x959   : > { %1407 = vadd.xlane.f32.xlu0 %v1406_v9 }
 0x966   : > { %1448 = vrot.lane.b32.xlu1 %v1669_v10, %s1804_s29 }
 0x96a   : > { %1461 = vrot.lane.b32.xlu1 %v1670_v11, %s1804_s29 }
 0x96f   : > { %1436 = vrot.lane.b32.xlu0 %v1668_v12, %s1804_s29 }
 0x9dc   : > { %v1405_v13 = vpop.xlane.xlu1 %1404 }
 0x9dd   : > { %v1415_v14 = vmul.f32 0.03125, %v1405_v13 }
 0x9df   : > { %v1419_v15 = vadd.f32 1e-05, %v1415_v14 }
 0x9e1   : > { %1787 = vrsqrt.f32 %v1419_v15 }
 0x9e2   : > { %v1411_v16 = vpop.xlane.xlu0 %1410  ;;  %v1414_v17 = vpop.xlane.xlu1 %1413 }
 0x9e3   : > { %v1417_v19 = vmul.f32 0.03125, %v1411_v16  ;;  %v1418_v20 = vmul.f32 0.03125, %v1414_v17 }
 0x9e5   : > { %v1421_v21 = vadd.f32 1e-05, %v1417_v19  ;;  %v1422_v22 = vadd.f32 1e-05, %v1418_v20 }
 0x9e6   : > { %v1408_v23 = vpop.xlane.xlu0 %1407  ;;  %v1449_v26 = vpop.permute.xlu1 %1448 }
 0x9e7   : > { %1789 = vrsqrt.f32 %v1421_v21  ;;  %v1416_v24 = vmul.f32 0.03125, %v1408_v23 }
 0x9e8   : > { %1791 = vrsqrt.f32 %v1422_v22 }
 0x9e9   : > { %v1420_v25 = vadd.f32 1e-05, %v1416_v24 }
 0x9ea   : > { %v1437_v30 = vpop.permute.xlu0 %1436  ;;  %v1462_v33 = vpop.permute.xlu1 %1461 }
 0x9eb   : > { %v1788_v27 = vpop.eup %1787  ;;  %1793 = vrsqrt.f32 %v1420_v25 }
 0x9ec   : > { %v1427_v31 = vmul.f32 %v1788_v27, %v1379_v53 }
 0x9ee   : > { %v1439_v32 = vmul.f32 %v1437_v30, %v1427_v31 }
 0x9f0   : > { %v1451_v34 = vadd.f32 %v1449_v26, %v1439_v32 }
 0x9f1   : > { %v1790_v35 = vpop.eup %1789 }
 0x9f2   : > { %v1792_v36 = vpop.eup %1791  ;;  %v1429_v38 = vmul.f32 %v1790_v35, %v1381_v62  ;;  %v1464_v39 = vmul.f32 %v1462_v33, %v1451_v34 }
 0x9f3   : > { %v1430_v40 = vmul.f32 %v1792_v36, %v1382_v63 }
 0x9f4   : > { %v1441_v41 = vmul.f32 %v1437_v30, %v1429_v38  ;;  %1472 = vrot.lane.b32.xlu0 %v1464_v39, %s1806_s21 }
 0x9f5   : > { %v1794_v42 = vpop.eup %1793  ;;  %v1442_v28 = vmul.f32 %v1437_v30, %v1430_v40 }
 0x9f6   : > { %v1428_v18 = vmul.f32 %v1794_v42, %v2084_v55  ;;  %v1453_v43 = vadd.f32 %v1449_v26, %v1441_v41 }
 0x9f7   : > { %v1454_v37 = vadd.f32 %v1449_v26, %v1442_v28 }
 0x9f8   : > { %v1440_v44 = vmul.f32 %v1437_v30, %v1428_v18  ;;  %v1466_v29 = vmul.f32 %v1462_v33, %v1453_v43 }
 0x9f9   : > { %v1467_v47 = vmul.f32 %v1462_v33, %v1454_v37 }
 0x9fa   : > { %v1452_v45 = vadd.f32 %v1449_v26, %v1440_v44  ;;  %1476 = vrot.lane.b32.xlu0 %v1466_v29, %s1806_s21 }
 0x9fc   : > { %v1465_v46 = vmul.f32 %v1462_v33, %v1452_v45 }
 0x9fe   : > { %1474 = vrot.lane.b32.xlu1 %v1465_v46, %s1806_s21 }
 0xa02   : > { %1478 = vrot.lane.b32.xlu1 %v1467_v47, %s1806_s21 }
 0xa66   : > { %v1473_v48 = vpop.permute.xlu0 %1472 }
 0xa67   : > { %v1484_v49 = vsel %vm860_vm2, %v1473_v48, 0.0 }
 0xa68   : > { %1485 = vadd.xlane.f32.xlu0 %v1484_v49 }
 0xa6c   : > { %v1477_v50 = vpop.permute.xlu0 %1476 }
 0xa6d   : > { %v1490_v51 = vsel %vm860_vm2, %v1477_v50, 0.0 }
 0xa6e   : > { %1491 = vadd.xlane.f32.xlu0 %v1490_v51 }
 0xa70   : > { %v1475_v52 = vpop.permute.xlu1 %1474 }
 0xa71   : > { %v1487_v53 = vsel %vm860_vm2, %v1475_v52, 0.0 }
 0xa72   : > { %1488 = vadd.xlane.f32.xlu1 %v1487_v53 }
 0xa74   : > { %v1479_v54 = vpop.permute.xlu1 %1478 }
 0xa75   : > { %v1493_v55 = vsel %vm860_vm2, %v1479_v54, 0.0 }
 0xa76   : > { %1494 = vadd.xlane.f32.xlu0 %v1493_v55 }
 0xaf5   : > { %v1486_v57 = vpop.xlane.xlu0 %1485 }
 0xaf6   : > { %v1503_v58 = vadd.f32 %v1671_v56, %v1486_v57 }
 0xaf8   : > { %1508 = vst.msk [vmem:[%s685_s30] sm:$0xff] %vm1507_vm4, %v1503_v58 }
 0xafb   : > { %v1492_v59 = vpop.xlane.xlu0 %1491 }
 0xafc   : > { %v1505_v60 = vadd.f32 %v1671_v56, %v1492_v59 }
 0xafe   : > { %1510 = vst.msk [vmem:[%s685_s30 + $0x10] sm:$0xff] %vm1507_vm4, %v1505_v60 }
 0xaff   : > { %v1489_v61 = vpop.xlane.xlu1 %1488 }
 0xb00   : > { %v1504_v62 = vadd.f32 %v1671_v56, %v1489_v61 }
 0xb02   : > { %1509 = vst.msk [vmem:[%s685_s30 + $0x8] sm:$0xff] %vm1507_vm4, %v1504_v62 }
 0xb03   : > { %v1495_v63 = vpop.xlane.xlu0 %1494 }
 0xb04   : > { %v1506_v0 = vadd.f32 %v1671_v56, %v1495_v63 }
 0xb06   : > { %1511 = vst.msk [vmem:[%s685_s30 + $0x18] sm:$0xff] %vm1507_vm4, %v1506_v0 }
 0xb07 PF: > { %s33_s23 = sadd.s32 1, %s1801_s23  }
 0xb08   : > { %p30_p4 = scmp.ge.s32.totalorder %s33_s23, 5  }
 0xb0a   :  { %32 = sbr.rel (!%p30_p4) target bundleno = 6 (0x6), region = 144 }

</bundles_post_ra>
